<compile_context>
chip_gen: v7x
topology: tpu7x:2x2x1
jax: 0.10.0
libtpu: 0.0.40
codegen_flags: <defaults>
</compile_context>

<pallas_src>
import jax
import jax.numpy as jnp
import numpy as np
from jax.experimental import pallas as pl
from jax.experimental.pallas import tpu as pltpu


def residual_block_kernel(xt_ref, w0t_ref, b0_ref, wrt_ref, brr_ref,
                          sa_ref, tb_ref, cg_ref, w2t_ref, b2_ref, out_ref):
    # Transposed layout: activations are [features, tile_b] so every intermediate and
    # the output are lane-dense (tile_b on the 128-lane axis) and every matmul has
    # N = tile_b for good MXU fill.
    xt = xt_ref[...]                                                       # bf16 [n_in, tb]

    # layer 0: Linear(no bias; bn_cont folded into the weights) -> ReLU
    z0 = jnp.dot(w0t_ref[...], xt,
                 preferred_element_type=jnp.float32) + b0_ref[...]         # f32 [h1, tb]
    r0 = jnp.maximum(z0, 0.0)

    # residual block: branch Linear and skip (BN->Linear) fused into one [2*h2, h1] dot
    y = jnp.dot(wrt_ref[...], r0.astype(jnp.bfloat16),
                preferred_element_type=jnp.float32) + brr_ref[...]         # f32 [2*h2, tb]
    # rows [:h2] -> branch: ReLU then BN affine (s1, t1); rows [h2:] -> skip: identity.
    # sa/tb are zero and cg is one on the skip rows, so no mask / iota is needed.
    proc = jnp.maximum(y, 0.0) * sa_ref[...] + y * cg_ref[...] + tb_ref[...]

    # final Linear (with bias). w2t = [w2; w2].T, so this dot also performs branch+skip add.
    out = jnp.dot(w2t_ref[...], proc.astype(jnp.bfloat16),
                  preferred_element_type=jnp.float32) + b2_ref[...]        # f32 [out, tb]
    out_ref[...] = out.astype(out_ref.dtype)


def fold_params(p):
    """One-time weight folding of the eval-mode BN affines (done outside pallas_call)."""
    f32 = jnp.float32
    h2 = p["w1"].shape[1]

    # (a) fold bn_cont (cont_s, cont_t) into the continuous half of W0
    w0c = p["w0c"] * p["cont_s"].reshape(-1, 1)                 # (n_cont, h1)
    b0 = p["cont_t"] @ p["w0c"]                                 # (1, h1)
    w0 = jnp.concatenate([p["w0e"], w0c], axis=0)               # (n_in, h1)

    # (c) fold layer-0 BN (s0, t0) into the two downstream matmuls
    w1p = p["w1"] * p["s0"].reshape(-1, 1)                      # (h1, h2)
    b1 = p["t0"] @ p["w1"]                                      # (1, h2)
    # (b) fold skip-path BN (ssk, tsk) together with s0/t0 into wsk
    wskp = p["wsk"] * (p["s0"] * p["ssk"]).reshape(-1, 1)       # (h1, h2)
    bsk = (p["t0"] * p["ssk"] + p["tsk"]) @ p["wsk"]            # (1, h2)

    wres = jnp.concatenate([w1p, wskp], axis=1)                 # (h1, 2*h2)
    bres = jnp.concatenate([b1, bsk], axis=1)                   # (1, 2*h2)

    # per-row post-matmul treatment of the fused residual output
    sa = jnp.concatenate([p["s1"], jnp.zeros((1, h2), f32)], axis=1)   # branch ReLU-affine scale
    tb = jnp.concatenate([p["t1"], jnp.zeros((1, h2), f32)], axis=1)   # branch ReLU-affine shift
    cg = jnp.concatenate([jnp.zeros((1, h2), f32),
                          jnp.ones((1, h2), f32)], axis=1)             # skip identity gate

    w2s = jnp.concatenate([p["w2"], p["w2"]], axis=0)           # (2*h2, out): h1@w2 == proc@[w2;w2]

    bf16 = jnp.bfloat16
    return dict(
        w0t=w0.T.astype(bf16),        # (h1, n_in)
        b0=b0.T.astype(f32),          # (h1, 1)
        wrt=wres.T.astype(bf16),      # (2*h2, h1)
        brr=bres.T.astype(f32),       # (2*h2, 1)
        sa=sa.T.astype(f32),          # (2*h2, 1)
        tb=tb.T.astype(f32),          # (2*h2, 1)
        cg=cg.T.astype(f32),          # (2*h2, 1)
        w2t=w2s.T.astype(bf16),       # (out, 2*h2)
        b2=p["b2"].T.astype(f32),     # (out, 1)
    )


def cardinal_residual_forward(x_emb, x_cont, folded, *, tile_b=256):
    """x_emb: [B, n_emb] f32 (already-gathered embeddings), x_cont: [B, n_cont] f32."""
    assert tile_b % 128 == 0, "tile_b must be a multiple of 128 (lane dimension)"
    B = x_emb.shape[0]
    n_in = x_emb.shape[1] + x_cont.shape[1]
    out_sz = folded["b2"].shape[0]

    grid_b = pl.cdiv(B, tile_b)
    b_pad = grid_b * tile_b

    x = jnp.concatenate([x_emb, x_cont], axis=1)                 # [B, n_in]
    if b_pad != B:
        x = jnp.pad(x, ((0, b_pad - B), (0, 0)))
    # layout plumbing: feature-major, bf16 (halves activation HBM bytes)
    xt = x.T.astype(jnp.bfloat16)                                # [n_in, b_pad]

    weight_names = ("w0t", "b0", "wrt", "brr", "sa", "tb", "cg", "w2t", "b2")
    weights = [folded[k] for k in weight_names]

    def resident(arr):
        # whole (tiny) array resident in VMEM; constant index_map -> no re-DMA per step
        return pl.BlockSpec(arr.shape, lambda i: (0, 0))

    # NOTE: if a profile ever shows exposed input DMA, add
    #   pipeline_mode=pl.Buffered(3) to the xt BlockSpec below.
    out_t = pl.pallas_call(
        residual_block_kernel,
        out_shape=jax.ShapeDtypeStruct((out_sz, b_pad), jnp.float32),
        grid=(grid_b,),
        in_specs=[pl.BlockSpec((n_in, tile_b), lambda i: (0, i))]
                 + [resident(a) for a in weights],
        out_specs=pl.BlockSpec((out_sz, tile_b), lambda i: (0, i)),
        compiler_params=pltpu.CompilerParams(dimension_semantics=("parallel",)),
    )(xt, *weights)

    return out_t.T[:B]                                           # [B, out_sz]


def reference_forward(x_emb, x_cont, p):
    """Pure-JAX f32 reference mirroring the PyTorch forward (eval mode, unfolded)."""
    xc = x_cont * p["cont_s"] + p["cont_t"]
    x = jnp.concatenate([x_emb, xc], axis=1)
    w0 = jnp.concatenate([p["w0e"], p["w0c"]], axis=0)
    h0 = jnp.maximum(x @ w0, 0.0) * p["s0"] + p["t0"]
    fx = jnp.maximum(h0 @ p["w1"], 0.0) * p["s1"] + p["t1"]
    skip = (h0 * p["ssk"] + p["tsk"]) @ p["wsk"]
    h1 = fx + skip
    return h1 @ p["w2"] + p["b2"]


def reference_forward_folded(x_emb, x_cont, fp):
    """Mirrors the kernel math exactly (folded weights + bf16 matmul operands)."""
    x = jnp.concatenate([x_emb, x_cont], axis=1).astype(jnp.bfloat16)
    z0 = jnp.dot(x, fp["w0t"].T, preferred_element_type=jnp.float32) + fp["b0"].T
    r0 = jnp.maximum(z0, 0.0)
    y = jnp.dot(r0.astype(jnp.bfloat16), fp["wrt"].T,
                preferred_element_type=jnp.float32) + fp["brr"].T
    proc = jnp.maximum(y, 0.0) * fp["sa"].T + y * fp["cg"].T + fp["tb"].T
    return jnp.dot(proc.astype(jnp.bfloat16), fp["w2t"].T,
                   preferred_element_type=jnp.float32) + fp["b2"].T


def _folded_bn(key, n):
    k1, k2, k3, k4 = jax.random.split(key, 4)
    gamma = 1.0 + 0.1 * jax.random.normal(k1, (n,))
    beta = 0.1 * jax.random.normal(k2, (n,))
    mean = 0.1 * jax.random.normal(k3, (n,))
    var = 1.0 + 0.1 * jnp.abs(jax.random.normal(k4, (n,)))
    scale = gamma * jax.lax.rsqrt(var + 1e-5)
    shift = beta - mean * scale
    return (scale.reshape(1, n).astype(jnp.float32),
            shift.reshape(1, n).astype(jnp.float32))


def _linear_w(key, n_in, n_out):
    # PyTorch kaiming-uniform-ish init; stored as [in, out] (= torch weight.T)
    lim = 1.0 / np.sqrt(n_in)
    return jax.random.uniform(key, (n_in, n_out), jnp.float32, -lim, lim)


if __name__ == "__main__":
    key = jax.random.PRNGKey(0)
    ks = jax.random.split(key, 16)

    # model config
    emb_szs = [(10, 4), (7, 4)]
    n_emb = sum(nf for _, nf in emb_szs)          # 8
    n_cont = 8
    h1, h2 = 32, 64                               # layers=[32, 64]
    out_sz = 4
    B = 512                                       # tile_b=256 -> grid=(2,): both v7x TCs busy

    # embeddings (deterministic synthetic init)
    emb0 = 0.01 * jax.random.normal(ks[0], (emb_szs[0][0], emb_szs[0][1]), jnp.float32)
    emb1 = 0.01 * jax.random.normal(ks[1], (emb_szs[1][0], emb_szs[1][1]), jnp.float32)

    # inputs
    x_cat = jnp.stack(
        [jax.random.randint(ks[2], (B,), 0, emb_szs[0][0]),
         jax.random.randint(ks[3], (B,), 0, emb_szs[1][0])], axis=1)        # [B, 2]
    x_cont = jax.random.normal(ks[4], (B, n_cont), jnp.float32)              # [B, 8]

    # embedding gather + concat (glue; matches torch.cat([e(x_cat[:,i]) ...], 1))
    x_emb = jnp.concatenate([emb0[x_cat[:, 0]], emb1[x_cat[:, 1]]], axis=1)  # [B, 8]

    # raw parameters (BatchNorms as eval-mode per-feature scale/shift)
    cont_s, cont_t = _folded_bn(ks[5], n_cont)       # bn_cont
    w0 = _linear_w(ks[6], n_emb + n_cont, h1)        # layer 0 Linear (bias=False)
    s0, t0 = _folded_bn(ks[7], h1)                   # layer 0 BN
    w1 = _linear_w(ks[8], h1, h2)                    # residual branch Linear (bias=False)
    s1, t1 = _folded_bn(ks[9], h2)                   # residual branch BN
    ssk, tsk = _folded_bn(ks[10], h1)                # residual skip BN (on n_in)
    wsk = _linear_w(ks[11], h1, h2)                  # residual skip Linear (bias=False)
    w2 = _linear_w(ks[12], h2, out_sz)               # final Linear (bias=True)
    b2 = 0.1 * jax.random.normal(ks[13], (1, out_sz), jnp.float32)

    raw = dict(cont_s=cont_s, cont_t=cont_t,
               w0e=w0[:n_emb], w0c=w0[n_emb:], s0=s0, t0=t0,
               w1=w1, s1=s1, t1=t1,
               wsk=wsk, ssk=ssk, tsk=tsk,
               w2=w2, b2=b2)

    folded = fold_params(raw)                        # one-time weight folding

    out = cardinal_residual_forward(x_emb, x_cont, folded, tile_b=256)
    out = jax.block_until_ready(out)

    # tight check vs. a pure-JAX reference that mirrors the kernel math (folded + bf16)
    ref_bf16 = reference_forward_folded(x_emb, x_cont, folded)
    np.testing.assert_allclose(np.asarray(out), np.asarray(ref_bf16),
                               rtol=2e-3, atol=2e-3)

    # loose sanity check vs. the original unfolded f32 reference (bf16 operand rounding)
    ref_f32 = reference_forward(x_emb, x_cont, raw)
    np.testing.assert_allclose(np.asarray(out), np.asarray(ref_f32),
                               rtol=1e-1, atol=8e-2)

    print("KERNEL_OK")
</pallas_src>

<mosaic_0001>
module attributes {stable_mosaic.version = 11 : i64} {
  func.func @residual_block_kernel(%arg0: i32, %arg1: memref<16x256xbf16, #tpu.memory_space<vmem>>, %arg2: memref<32x16xbf16, #tpu.memory_space<vmem>>, %arg3: memref<32x1xf32, #tpu.memory_space<vmem>>, %arg4: memref<128x32xbf16, #tpu.memory_space<vmem>>, %arg5: memref<128x1xf32, #tpu.memory_space<vmem>>, %arg6: memref<128x1xf32, #tpu.memory_space<vmem>>, %arg7: memref<128x1xf32, #tpu.memory_space<vmem>>, %arg8: memref<128x1xf32, #tpu.memory_space<vmem>>, %arg9: memref<4x128xbf16, #tpu.memory_space<vmem>>, %arg10: memref<4x1xf32, #tpu.memory_space<vmem>>, %arg11: memref<4x256xf32, #tpu.memory_space<vmem>>) attributes {dimension_semantics = [#tpu.dimension_semantics<parallel>], iteration_bounds = array<i64: 2>, scalar_prefetch = 0 : i64, scratch_operands = 0 : i64, tpu.core_type = #tpu.core_type<tc>, window_params = [{transform_indices = @transform_0, window_bounds = array<i64: 16, 256>}, {pipeline_mode = #tpu.pipeline_mode<synchronous>, transform_indices = @transform_1, window_bounds = array<i64: 32, 16>}, {pipeline_mode = #tpu.pipeline_mode<synchronous>, transform_indices = @transform_2, window_bounds = array<i64: 32, 1>}, {pipeline_mode = #tpu.pipeline_mode<synchronous>, transform_indices = @transform_3, window_bounds = array<i64: 128, 32>}, {pipeline_mode = #tpu.pipeline_mode<synchronous>, transform_indices = @transform_4, window_bounds = array<i64: 128, 1>}, {pipeline_mode = #tpu.pipeline_mode<synchronous>, transform_indices = @transform_5, window_bounds = array<i64: 128, 1>}, {pipeline_mode = #tpu.pipeline_mode<synchronous>, transform_indices = @transform_6, window_bounds = array<i64: 128, 1>}, {pipeline_mode = #tpu.pipeline_mode<synchronous>, transform_indices = @transform_7, window_bounds = array<i64: 128, 1>}, {pipeline_mode = #tpu.pipeline_mode<synchronous>, transform_indices = @transform_8, window_bounds = array<i64: 4, 128>}, {pipeline_mode = #tpu.pipeline_mode<synchronous>, transform_indices = @transform_9, window_bounds = array<i64: 4, 1>}, {transform_indices = @transform_10, window_bounds = array<i64: 4, 256>}]} {
    %c0 = arith.constant 0 : index
    %c0_0 = arith.constant 0 : index
    %0 = vector.load %arg1[%c0, %c0_0] : memref<16x256xbf16, #tpu.memory_space<vmem>>, vector<16x256xbf16>
    %c0_1 = arith.constant 0 : index
    %c0_2 = arith.constant 0 : index
    %1 = vector.load %arg2[%c0_1, %c0_2] : memref<32x16xbf16, #tpu.memory_space<vmem>>, vector<32x16xbf16>
    %cst = arith.constant dense<0.000000e+00> : vector<32x256xf32>
    %2 = tpu.matmul %1, %0, %cst {dimension_numbers = #tpu.dot_dimension_numbers<[1], [0], [0], [1], [0, 0, 1, 1], [], []>} : vector<32x16xbf16>, vector<16x256xbf16>, vector<32x256xf32> -> vector<32x256xf32>
    %c0_3 = arith.constant 0 : index
    %c0_4 = arith.constant 0 : index
    %3 = vector.load %arg3[%c0_3, %c0_4] : memref<32x1xf32, #tpu.memory_space<vmem>>, vector<32x1xf32>
    %4 = vector.broadcast %3 : vector<32x1xf32> to vector<32x256xf32>
    %5 = arith.addf %2, %4 : vector<32x256xf32>
    %cst_5 = arith.constant 0.000000e+00 : f32
    %6 = vector.broadcast %cst_5 : f32 to vector<32x256xf32>
    %7 = arith.maximumf %5, %6 : vector<32x256xf32>
    %c0_6 = arith.constant 0 : index
    %c0_7 = arith.constant 0 : index
    %8 = vector.load %arg4[%c0_6, %c0_7] : memref<128x32xbf16, #tpu.memory_space<vmem>>, vector<128x32xbf16>
    %9 = arith.truncf %7 : vector<32x256xf32> to vector<32x256xbf16>
    %cst_8 = arith.constant dense<0.000000e+00> : vector<128x256xf32>
    %10 = tpu.matmul %8, %9, %cst_8 {dimension_numbers = #tpu.dot_dimension_numbers<[1], [0], [0], [1], [0, 0, 1, 1], [], []>} : vector<128x32xbf16>, vector<32x256xbf16>, vector<128x256xf32> -> vector<128x256xf32>
    %c0_9 = arith.constant 0 : index
    %c0_10 = arith.constant 0 : index
    %11 = vector.load %arg5[%c0_9, %c0_10] : memref<128x1xf32, #tpu.memory_space<vmem>>, vector<128x1xf32>
    %12 = vector.broadcast %11 : vector<128x1xf32> to vector<128x256xf32>
    %13 = arith.addf %10, %12 : vector<128x256xf32>
    %cst_11 = arith.constant 0.000000e+00 : f32
    %14 = vector.broadcast %cst_11 : f32 to vector<128x256xf32>
    %15 = arith.maximumf %13, %14 : vector<128x256xf32>
    %c0_12 = arith.constant 0 : index
    %c0_13 = arith.constant 0 : index
    %16 = vector.load %arg6[%c0_12, %c0_13] : memref<128x1xf32, #tpu.memory_space<vmem>>, vector<128x1xf32>
    %17 = vector.broadcast %16 : vector<128x1xf32> to vector<128x256xf32>
    %18 = arith.mulf %15, %17 : vector<128x256xf32>
    %c0_14 = arith.constant 0 : index
    %c0_15 = arith.constant 0 : index
    %19 = vector.load %arg8[%c0_14, %c0_15] : memref<128x1xf32, #tpu.memory_space<vmem>>, vector<128x1xf32>
    %20 = vector.broadcast %19 : vector<128x1xf32> to vector<128x256xf32>
    %21 = arith.mulf %13, %20 : vector<128x256xf32>
    %22 = arith.addf %18, %21 : vector<128x256xf32>
    %c0_16 = arith.constant 0 : index
    %c0_17 = arith.constant 0 : index
    %23 = vector.load %arg7[%c0_16, %c0_17] : memref<128x1xf32, #tpu.memory_space<vmem>>, vector<128x1xf32>
    %24 = vector.broadcast %23 : vector<128x1xf32> to vector<128x256xf32>
    %25 = arith.addf %22, %24 : vector<128x256xf32>
    %c0_18 = arith.constant 0 : index
    %c0_19 = arith.constant 0 : index
    %26 = vector.load %arg9[%c0_18, %c0_19] : memref<4x128xbf16, #tpu.memory_space<vmem>>, vector<4x128xbf16>
    %27 = arith.truncf %25 : vector<128x256xf32> to vector<128x256xbf16>
    %cst_20 = arith.constant dense<0.000000e+00> : vector<4x256xf32>
    %28 = tpu.matmul %26, %27, %cst_20 {dimension_numbers = #tpu.dot_dimension_numbers<[1], [0], [0], [1], [0, 0, 1, 1], [], []>} : vector<4x128xbf16>, vector<128x256xbf16>, vector<4x256xf32> -> vector<4x256xf32>
    %c0_21 = arith.constant 0 : index
    %c0_22 = arith.constant 0 : index
    %29 = vector.load %arg10[%c0_21, %c0_22] : memref<4x1xf32, #tpu.memory_space<vmem>>, vector<4x1xf32>
    %30 = vector.broadcast %29 : vector<4x1xf32> to vector<4x256xf32>
    %31 = arith.addf %28, %30 : vector<4x256xf32>
    %c0_23 = arith.constant 0 : index
    %c0_24 = arith.constant 0 : index
    %32 = vector.load %arg11[%c0_23, %c0_24] : memref<4x256xf32, #tpu.memory_space<vmem>>, vector<4x256xf32>
    tpu.vector_store %arg11[%c0_23, %c0_24], %31 {strides = array<i32>} : memref<4x256xf32, #tpu.memory_space<vmem>>, vector<4x256xf32>,
    return
  }
  func.func @transform_0(%arg0: i32) -> (i32, i32) {
    %c0_i32 = arith.constant 0 : i32
    %c0_i32_0 = arith.constant 0 : i32
    return %c0_i32, %arg0 : i32, i32
  }
  func.func @transform_1(%arg0: i32) -> (i32, i32) {
    %c0_i32 = arith.constant 0 : i32
    %c0_i32_0 = arith.constant 0 : i32
    %c0_i32_1 = arith.constant 0 : i32
    return %c0_i32, %c0_i32_0 : i32, i32
  }
  func.func @transform_2(%arg0: i32) -> (i32, i32) {
    %c0_i32 = arith.constant 0 : i32
    %c0_i32_0 = arith.constant 0 : i32
    %c0_i32_1 = arith.constant 0 : i32
    return %c0_i32, %c0_i32_0 : i32, i32
  }
  func.func @transform_3(%arg0: i32) -> (i32, i32) {
    %c0_i32 = arith.constant 0 : i32
    %c0_i32_0 = arith.constant 0 : i32
    %c0_i32_1 = arith.constant 0 : i32
    return %c0_i32, %c0_i32_0 : i32, i32
  }
  func.func @transform_4(%arg0: i32) -> (i32, i32) {
    %c0_i32 = arith.constant 0 : i32
    %c0_i32_0 = arith.constant 0 : i32
    %c0_i32_1 = arith.constant 0 : i32
    return %c0_i32, %c0_i32_0 : i32, i32
  }
  func.func @transform_5(%arg0: i32) -> (i32, i32) {
    %c0_i32 = arith.constant 0 : i32
    %c0_i32_0 = arith.constant 0 : i32
    %c0_i32_1 = arith.constant 0 : i32
    return %c0_i32, %c0_i32_0 : i32, i32
  }
  func.func @transform_6(%arg0: i32) -> (i32, i32) {
    %c0_i32 = arith.constant 0 : i32
    %c0_i32_0 = arith.constant 0 : i32
    %c0_i32_1 = arith.constant 0 : i32
    return %c0_i32, %c0_i32_0 : i32, i32
  }
  func.func @transform_7(%arg0: i32) -> (i32, i32) {
    %c0_i32 = arith.constant 0 : i32
    %c0_i32_0 = arith.constant 0 : i32
    %c0_i32_1 = arith.constant 0 : i32
    return %c0_i32, %c0_i32_0 : i32, i32
  }
  func.func @transform_8(%arg0: i32) -> (i32, i32) {
    %c0_i32 = arith.constant 0 : i32
    %c0_i32_0 = arith.constant 0 : i32
    %c0_i32_1 = arith.constant 0 : i32
    return %c0_i32, %c0_i32_0 : i32, i32
  }
  func.func @transform_9(%arg0: i32) -> (i32, i32) {
    %c0_i32 = arith.constant 0 : i32
    %c0_i32_0 = arith.constant 0 : i32
    %c0_i32_1 = arith.constant 0 : i32
    return %c0_i32, %c0_i32_0 : i32, i32
  }
  func.func @transform_10(%arg0: i32) -> (i32, i32) {
    %c0_i32 = arith.constant 0 : i32
    %c0_i32_0 = arith.constant 0 : i32
    return %c0_i32, %arg0 : i32, i32
  }
}

</mosaic_0001>

<bundles_post_ra>
// kernel: tpu_custom_call.1
= control target key start
LH: loop header
LB: loop body
LE: loop exit
PB: predicated region body
PF: predicated region fallthrough
CT: control target
= control target key end

     0   :  { %15 = vsyncpa [#allocation4], 0  ;;  %s2194_s0 = inlined_call_operand.vmem [shape: bf16[16,512], index: 0, kind: input, shape index: {}]   ;;  %s2195_s1 = inlined_call_operand.vmem [shape: bf16[32,16], index: 1, kind: input, shape index: {}]   ;;  %s2196_s2 = inlined_call_operand.vmem [shape: f32[32,1], index: 2, kind: input, shape index: {}]   ;;  %s2197_s3 = inlined_call_operand.vmem [shape: bf16[128,32], index: 3, kind: input, shape index: {}]   ;;  %s2198_s4 = inlined_call_operand.vmem [shape: f32[128,1], index: 4, kind: input, shape index: {}]   ;;  %s2199_s5 = inlined_call_operand.vmem [shape: f32[128,1], index: 5, kind: input, shape index: {}]   ;;  %s2200_s6 = inlined_call_operand.vmem [shape: f32[128,1], index: 6, kind: input, shape index: {}]   ;;  %s2201_s7 = inlined_call_operand.vmem [shape: f32[128,1], index: 7, kind: input, shape index: {}]   ;;  %s2202_s8 = inlined_call_operand.vmem [shape: bf16[4,128], index: 8, kind: input, shape index: {}]   ;;  %s2203_s9 = inlined_call_operand.vmem [shape: f32[4,1], index: 9, kind: input, shape index: {}]   ;;  %s2204_s10 = inlined_call_operand.hbm [shape: f32[4,512], index: 10, kind: output, shape index: {}]  }
   0x1   :  { %17 = vsyncpa [#allocation4 + $0x1], 0  ;;  %s1623_s13 = smov 0   ;;  %s1625_s14 = smov 0  }
   0x2   :  { %s1627_s15 = smov 0   ;;  %s1629_s16 = smov 0  }
   0x3 LB: > { %s1408_s17 = sadd.s32 4294967295, %s1564_s16   ;;  %s1409_s18 = sadd.s32 4294967294, %s1564_s16   ;;  %s1564_s16 = sphi %s1629_s16, %s2219_s16   ;;  %s1560_s15 = sphi %s1627_s15, %s2218_s15   ;;  %s1556_s14 = sphi %s1625_s14, %s2217_s14   ;;  %s1552_s13 = sphi %s1623_s13, %s2216_s13  }
   0x4   : > { %s1646_s19 = sadd.s32 1, %s1564_s16   ;;  %s30_s20 = sadd.s32 1, %s1560_s15 }
   0x5   : > { %s27_s21 = ssub.s32 %s1564_s16, %s1646_s19  ;;  %p37_p0 = scmp.ne.s32.totalorder %s1560_s15, %s1556_s14 }
   0x6   : > { %p28_p1 = scmp.eq.s32.totalorder %s27_s21, 0  ;;  %p38_p2 = scmp.eq.s32.totalorder %s1564_s16, 0 }
   0x7   : > { %p256_p3 = scmp.eq.s32.totalorder %s1408_s17, 1  ;;  %p261_p4 = scmp.ne.s32.totalorder %s1556_s14, %s1552_s13 }
   0x8   : > { %s1659_s22 = scalar_select %p28_p1, %s1560_s15, %s30_s20  }
   0x9   : > { %p39_p5 = por %p38_p2, %p37_p0  ;;  %p1661_p6 = por %p256_p3, %p37_p0 }
   0xa   : > { %p262_p7 = scmp.eq.s32.totalorder %s1409_s18, 1  ;;  %p1411_p9 = scmp.ge.s32.totalorder %s1564_s16, 2 }
   0xc   : > { %p1665_p8 = por %p262_p7, %p261_p4  ;;  %305 = sbr.rel (%p1411_p9) target bundleno = 26 (0x1a), region = 52 }
  0x13   : > { %308 = sbr.rel (!%p39_p5) target bundleno = 26 (0x1a), region = 56  ;;  %s310_s25 = sand.u32 (%p39_p5), 1, %s1560_s15  }
  0x14   : > { %s1445_s26 = sshll.u32 (%p39_p5), %s1564_s16, 3  ;;  %s1412_s27 = sshll.u32 (%p39_p5), %s310_s25, 4 }
  0x15   : > { %s315_s30 = scalar_lea.vmem (%p39_p5), %s2194_s0, %s1445_s26  ;;  %s312_s11 = scalar_lea.vmem (%p39_p5), [#allocation2], %s1412_s27 }
  0x16   : > { %v345_v0 = vld [vmem:[%s315_s30] sm:$0xff] (%p39_p5)  ;;  %v347_v1 = vld [vmem:[%s315_s30 + $0x10] sm:$0xff] (%p39_p5) }
  0x17   : > { %346 = vst [vmem:[%s312_s11] sm:$0xff] (%p39_p5), %v345_v0  ;;  %348 = vst [vmem:[%s312_s11 + $0x8] sm:$0xff] (%p39_p5), %v347_v1 }
  0x1a PF: > { %p1415_p10 = scmp.ge.s32.totalorder %s1564_s16, 1  ;;  %p353_p11 = scmp.lt.s32.totalorder %s1564_s16, 3 }
  0x1c   : > { %p354_p12 = pnand %p1415_p10, %p353_p11 }
  0x1e   : > { %357 = sbr.rel (%p354_p12) target bundleno = 796 (0x31c), region = 94 }
  0x25   : > { %v408_v2 = vld [vmem:[%s2196_s2 + $0x10] sm:$0xff]  ;;  %v406_v3 = vld [vmem:[%s2196_s2] sm:$0xff]  ;;  %s1686_s25 = sand.u32 1, %s1556_s14   ;;  %v1566_v4 = vmov 0   ;;  %v409_v5 = vld [vmem:[%s2196_s2 + $0x18] sm:$0xff]  ;;  %vm450_vm0 = vcmask 130048  }
  0x26   : > { %1488 = vset.pattern.permute.xlu1 %v1566_v4  ;;  %1487 = vset.pattern.permute.xlu0 %v1566_v4  ;;  %s1416_s28 = sshll.u32 %s1686_s25, 4  ;;  %v407_v6 = vld [vmem:[%s2196_s2 + $0x8] sm:$0xff]  ;;  %v538_v10 = vld [vmem:[%s2198_s4] sm:$0xff]  ;;  %v541_v12 = vld [vmem:[%s2198_s4 + $0x18] sm:$0xff]  ;;  %vm674_vm1 = vcmask 261120   ;;  %s1417_s20 = sshll.u32 %s1686_s25, 3 }
  0x27   : > { %422 = vperm.xlu1 %1488, %v408_v2   ;;  %412 = vperm.xlu0 %1487, %v406_v3   ;;  %s362_s11 = scalar_lea.vmem [#allocation2], %s1416_s28  ;;  %v539_v9 = vld [vmem:[%s2198_s4 + $0x8] sm:$0xff]  ;;  %v1492_v11 = vld [vmem:[%s2195_s1] sm:$0xff]   ;;  %v540_v13 = vld [vmem:[%s2198_s4 + $0x10] sm:$0xff]  ;;  %s1446_s21 = sshll.u32 %s1408_s17, 7 }
  0x28   : > { %v1489_v7 = vld [vmem:[%s362_s11 + $0x4] ss:$8 sps:$4 sm:$0xff]   ;;  %489 = vmatprep.mubr.bf16.mxu0 %v1566_v4  ;;  %731 = vmatprep.mubr.bf16.mxu1 %v1566_v4  ;;  %v1491_v8 = vld [vmem:[%s362_s11] ss:$8 sps:$4 sm:$0xff]   ;;  %s396_s26 = scalar_lea.vmem [#allocation3], %s1417_s20  ;;  %s2150_s30 = scalar_lea.hbm %s2204_s10, %s1446_s21 }
  0x29   : > { %457 = vmatprep.subr.bf16.mxu0 %v1489_v7  ;;  %v845_v14 = vld [vmem:[%s2199_s5 + $0x8] sm:$0xff]  ;;  %v844_v15 = vld [vmem:[%s2199_s5] sm:$0xff]  ;;  %v847_v21 = vld [vmem:[%s2199_s5 + $0x18] sm:$0xff]  ;;  %s1344_s27 = sshll.u32 %s396_s26, 4  ;;  %s1330_s11 = scalar_lea.sflag [#allocation4], %s1686_s25  ;;  %s2152_s27 = int_to_ptr.vmem [resolvable:$true] %s1344_s27 }
  0x2a   : > { %458 = vmatpush1.bf16.msra.mxu0 %v1491_v8  ;;  %v1493_v16 = vld [vmem:[%s2195_s1 + $0x8] sm:$0xff]   ;;  %v972_v18 = vld [vmem:[%s2201_s7] sm:$0xff]  ;;  %v846_v22 = vld [vmem:[%s2199_s5 + $0x10] sm:$0xff]  ;;  %s1502_s12 = scalar_lea.vmem %s2152_s27, 128  ;;  %s1567_s17 = smov [#allocation3]  }
  0x2b   : > { %427 = vperm.xlu1 %1488, %v409_v5   ;;  %417 = vperm.xlu0 %1487, %v407_v6   ;;  %v973_v17 = vld [vmem:[%s2201_s7 + $0x8] sm:$0xff]  ;;  %v542_v20 = vld [vmem:[%s2198_s4 + $0x20] sm:$0xff]  ;;  %v975_v23 = vld [vmem:[%s2201_s7 + $0x18] sm:$0xff]  ;;  %p1503_p13 = scmp.ne.s32.totalorder %s2152_s27, %s1502_s12  ;;  %s1506_s18 = sshll.u32 %s1567_s17, 4  ;;  %s1507_s18 = int_to_ptr.vmem [resolvable:$false] %s1506_s18 }
  0x2c   : > { %v543_v19 = vld [vmem:[%s2198_s4 + $0x28] sm:$0xff]  ;;  %v974_v24 = vld [vmem:[%s2201_s7 + $0x10] sm:$0xff]  ;;  %v1132_v26 = vld [vmem:[%s2200_s6] sm:$0xff]  ;;  %s1508_s20 = scalar_lea.vmem %s1507_s18, 256  ;;  %p1509_p2 = scmp.lt.s32.totalorder %s2152_s27, %s1507_s18 }
  0x2d   : > { %1422 = vmatmul.mubr.msk.bf16.vlgmr.msra.gmra.mrb[0].mxu0 %vm450_vm0, %v1492_v11  ;;  %v1133_v25 = vld [vmem:[%s2200_s6 + $0x8] sm:$0xff]  ;;  %v545_v27 = vld [vmem:[%s2198_s4 + $0x38] sm:$0xff]  ;;  %v544_v28 = vld [vmem:[%s2198_s4 + $0x30] sm:$0xff]  ;;  %p1504_p0 = pnand %p1503_p13, %p1661_p6  ;;  %p1510_p3 = scmp.lt.s32.totalorder %s1508_s20, %s1502_s12 }
  0x2e   : > { %499 = vmatprep.mubr.bf16.mxu0 %v1566_v4  ;;  %v849_v29 = vld [vmem:[%s2199_s5 + $0x28] sm:$0xff]  ;;  %v848_v30 = vld [vmem:[%s2199_s5 + $0x20] sm:$0xff]  ;;  %v1135_v33 = vld [vmem:[%s2200_s6 + $0x18] sm:$0xff] }
  0x2f   : > { %561 = vperm.xlu1 %1488, %v539_v9   ;;  %556 = vperm.xlu0 %1487, %v538_v10   ;;  %v977_v31 = vld [vmem:[%s2201_s7 + $0x28] sm:$0xff]  ;;  %v976_v32 = vld [vmem:[%s2201_s7 + $0x20] sm:$0xff]  ;;  %v1134_v34 = vld [vmem:[%s2200_s6 + $0x10] sm:$0xff]  ;;  %p1505_p1 = pneg %p1504_p0  ;;  %p1511_p4 = por %p1510_p3, %p1509_p2 }
  0x30   : > { %v547_v35 = vld [vmem:[%s2198_s4 + $0x48] sm:$0xff]  ;;  %v546_v36 = vld [vmem:[%s2198_s4 + $0x40] sm:$0xff]  ;;  %v851_v37 = vld [vmem:[%s2199_s5 + $0x38] sm:$0xff] }
  0x31   : > { %v850_v38 = vld [vmem:[%s2199_s5 + $0x30] sm:$0xff]  ;;  %v979_v39 = vld [vmem:[%s2201_s7 + $0x38] sm:$0xff]  ;;  %v1137_v41 = vld [vmem:[%s2200_s6 + $0x28] sm:$0xff]  ;;  %p1512_p5 = pnand %p1511_p4, %p1505_p1 }
  0x32   : > { %v978_v40 = vld [vmem:[%s2201_s7 + $0x30] sm:$0xff]  ;;  %v1136_v42 = vld [vmem:[%s2200_s6 + $0x20] sm:$0xff]  ;;  %v549_v43 = vld [vmem:[%s2198_s4 + $0x58] sm:$0xff] }
  0x33   : > { %571 = vperm.xlu1 %1488, %v541_v12   ;;  %566 = vperm.xlu0 %1487, %v540_v13   ;;  %v548_v44 = vld [vmem:[%s2198_s4 + $0x50] sm:$0xff]  ;;  %v853_v45 = vld [vmem:[%s2199_s5 + $0x48] sm:$0xff]  ;;  %v852_v46 = vld [vmem:[%s2199_s5 + $0x40] sm:$0xff] }
  0x34   : > { %v981_v47 = vld [vmem:[%s2201_s7 + $0x48] sm:$0xff]  ;;  %v980_v48 = vld [vmem:[%s2201_s7 + $0x40] sm:$0xff]  ;;  %v1139_v49 = vld [vmem:[%s2200_s6 + $0x38] sm:$0xff] }
  0x35   : > { %1423 = vmatmul.mubr.msk.bf16.gmra.mrb[4].mxu0 %vm450_vm0, %v1493_v16  ;;  %v1138_v50 = vld [vmem:[%s2200_s6 + $0x30] sm:$0xff]  ;;  %v551_v51 = vld [vmem:[%s2198_s4 + $0x68] sm:$0xff]  ;;  %v550_v52 = vld [vmem:[%s2198_s4 + $0x60] sm:$0xff] }
  0x36   : > { %1315 = vmatprep.mubr.bf16.mxu0 %v1566_v4  ;;  %v855_v53 = vld [vmem:[%s2199_s5 + $0x58] sm:$0xff]  ;;  %v854_v54 = vld [vmem:[%s2199_s5 + $0x50] sm:$0xff]  ;;  %v1141_v57 = vld [vmem:[%s2200_s6 + $0x48] sm:$0xff] }
  0x37   : > { %867 = vperm.xlu1 %1488, %v845_v14   ;;  %862 = vperm.xlu0 %1487, %v844_v15   ;;  %v983_v55 = vld [vmem:[%s2201_s7 + $0x58] sm:$0xff]  ;;  %v982_v56 = vld [vmem:[%s2201_s7 + $0x50] sm:$0xff]  ;;  %v1140_v58 = vld [vmem:[%s2200_s6 + $0x40] sm:$0xff] }
  0x38   : > { %v553_v59 = vld [vmem:[%s2198_s4 + $0x78] sm:$0xff]  ;;  %v552_v60 = vld [vmem:[%s2198_s4 + $0x70] sm:$0xff]  ;;  %v857_v61 = vld [vmem:[%s2199_s5 + $0x68] sm:$0xff] }
  0x39   : > { %v856_v62 = vld [vmem:[%s2199_s5 + $0x60] sm:$0xff]  ;;  %v985_v63 = vld [vmem:[%s2201_s7 + $0x68] sm:$0xff]  ;;  %v1143_v1 = vld [vmem:[%s2200_s6 + $0x58] sm:$0xff] }
  0x3a   : > { %v984_v0 = vld [vmem:[%s2201_s7 + $0x60] sm:$0xff]  ;;  %v1142_v2 = vld [vmem:[%s2200_s6 + $0x50] sm:$0xff]  ;;  %v859_v3 = vld [vmem:[%s2199_s5 + $0x78] sm:$0xff] }
  0x3b   : > { %995 = vperm.xlu1 %1488, %v973_v17   ;;  %990 = vperm.xlu0 %1487, %v972_v18   ;;  %v858_v5 = vld [vmem:[%s2199_s5 + $0x70] sm:$0xff]  ;;  %v987_v6 = vld [vmem:[%s2201_s7 + $0x78] sm:$0xff]  ;;  %v1145_v8 = vld [vmem:[%s2200_s6 + $0x68] sm:$0xff] }
  0x3c   : > { %v986_v7 = vld [vmem:[%s2201_s7 + $0x70] sm:$0xff]  ;;  %v1144_v9 = vld [vmem:[%s2200_s6 + $0x60] sm:$0xff]  ;;  %v1147_v10 = vld [vmem:[%s2200_s6 + $0x78] sm:$0xff] }
  0x3d   : > { %v1146_v11 = vld [vmem:[%s2200_s6 + $0x70] sm:$0xff]  ;;  %v1277_v12 = vld [vmem:[%s2203_s9] sm:$0xf] }
  0x3f   : > { %581 = vperm.xlu1 %1488, %v543_v19   ;;  %576 = vperm.xlu0 %1487, %v542_v20  }
  0x43   : > { %877 = vperm.xlu1 %1488, %v847_v21   ;;  %872 = vperm.xlu0 %1487, %v846_v22  }
  0x47   : > { %1005 = vperm.xlu1 %1488, %v975_v23   ;;  %1000 = vperm.xlu0 %1487, %v974_v24  }
  0x4b   : > { %1155 = vperm.xlu1 %1488, %v1133_v25   ;;  %1150 = vperm.xlu0 %1487, %v1132_v26  }
  0x4f   : > { %591 = vperm.xlu1 %1488, %v545_v27   ;;  %586 = vperm.xlu0 %1487, %v544_v28  }
  0x53   : > { %887 = vperm.xlu1 %1488, %v849_v29   ;;  %882 = vperm.xlu0 %1487, %v848_v30  }
  0x57   : > { %1015 = vperm.xlu1 %1488, %v977_v31   ;;  %1010 = vperm.xlu0 %1487, %v976_v32  }
  0x5b   : > { %1165 = vperm.xlu1 %1488, %v1135_v33   ;;  %1160 = vperm.xlu0 %1487, %v1134_v34  }
  0x5f   : > { %601 = vperm.xlu1 %1488, %v547_v35   ;;  %596 = vperm.xlu0 %1487, %v546_v36  }
  0x63   : > { %897 = vperm.xlu1 %1488, %v851_v37   ;;  %892 = vperm.xlu0 %1487, %v850_v38  }
  0x67   : > { %1025 = vperm.xlu1 %1488, %v979_v39   ;;  %1020 = vperm.xlu0 %1487, %v978_v40  }
  0x6b   : > { %1175 = vperm.xlu1 %1488, %v1137_v41   ;;  %1170 = vperm.xlu0 %1487, %v1136_v42  }
  0x6f   : > { %611 = vperm.xlu1 %1488, %v549_v43   ;;  %606 = vperm.xlu0 %1487, %v548_v44  }
  0x73   : > { %907 = vperm.xlu1 %1488, %v853_v45   ;;  %902 = vperm.xlu0 %1487, %v852_v46   ;;  %v1494_v45 = vld [vmem:[%s2197_s3] sm:$0xff]   ;;  %v1495_v46 = vld [vmem:[%s2197_s3 + $0x8] sm:$0xff]  }
  0x77   : > { %1035 = vperm.xlu1 %1488, %v981_v47   ;;  %1030 = vperm.xlu0 %1487, %v980_v48   ;;  %v1496_v47 = vld [vmem:[%s2197_s3 + $0x10] sm:$0xff]   ;;  %v1497_v48 = vld [vmem:[%s2197_s3 + $0x18] sm:$0xff]  }
  0x7b   : > { %1185 = vperm.xlu1 %1488, %v1139_v49   ;;  %1180 = vperm.xlu0 %1487, %v1138_v50   ;;  %v1498_v49 = vld [vmem:[%s2197_s3 + $0x20] sm:$0xff]   ;;  %v1499_v50 = vld [vmem:[%s2197_s3 + $0x28] sm:$0xff]  }
  0x7f   : > { %621 = vperm.xlu1 %1488, %v551_v51   ;;  %616 = vperm.xlu0 %1487, %v550_v52   ;;  %v1500_v51 = vld [vmem:[%s2197_s3 + $0x30] sm:$0xff]   ;;  %v1501_v52 = vld [vmem:[%s2197_s3 + $0x38] sm:$0xff]  }
  0x83   : > { %917 = vperm.xlu1 %1488, %v855_v53   ;;  %912 = vperm.xlu0 %1487, %v854_v54  }
  0x87   : > { %1045 = vperm.xlu1 %1488, %v983_v55   ;;  %1040 = vperm.xlu0 %1487, %v982_v56  }
  0x8b   : > { %1195 = vperm.xlu1 %1488, %v1141_v57   ;;  %1190 = vperm.xlu0 %1487, %v1140_v58  }
  0x8f   : > { %631 = vperm.xlu1 %1488, %v553_v59   ;;  %626 = vperm.xlu0 %1487, %v552_v60  }
  0x93   : > { %927 = vperm.xlu1 %1488, %v857_v61   ;;  %922 = vperm.xlu0 %1487, %v856_v62  }
  0x97   : > { %1055 = vperm.xlu1 %1488, %v985_v63   ;;  %1050 = vperm.xlu0 %1487, %v984_v0  }
  0x9b   : > { %1205 = vperm.xlu1 %1488, %v1143_v1   ;;  %1200 = vperm.xlu0 %1487, %v1142_v2  }
  0x9f   : > { %937 = vperm.xlu1 %1488, %v859_v3   ;;  %932 = vperm.xlu0 %1487, %v858_v5  }
  0xa3   : > { %1065 = vperm.xlu1 %1488, %v987_v6   ;;  %1060 = vperm.xlu0 %1487, %v986_v7  }
  0xa6   : > { %v413_v13 = vpop.permute.xlu0 %412  ;;  %v423_v22 = vpop.permute.xlu1 %422 }
  0xa7   : > { %1215 = vperm.xlu1 %1488, %v1145_v8   ;;  %1210 = vperm.xlu0 %1487, %v1144_v9  }
  0xaa   : > { %v418_v17 = vpop.permute.xlu0 %417  ;;  %v428_v33 = vpop.permute.xlu1 %427 }
  0xab   : > { %1225 = vperm.xlu1 %1488, %v1147_v10   ;;  %1220 = vperm.xlu0 %1487, %v1146_v11  }
  0xae   : > { %v562_v53 = vpop.permute.xlu1 %561  ;;  %v557_v54 = vpop.permute.xlu0 %556 }
  0xaf   : > { %1280 = vperm.xlu0 %1487, %v1277_v12  }
  0xb2   : > { %v1941_v55 = vpop.permute.xlu1 %571  ;;  %v1943_v56 = vpop.permute.xlu0 %566 }
  0xb6   : > { %v868_v57 = vpop.permute.xlu1 %867  ;;  %v863_v58 = vpop.permute.xlu0 %862 }
  0xba   : > { %v996_v59 = vpop.permute.xlu1 %995  ;;  %v991_v60 = vpop.permute.xlu0 %990 }
  0xbe   : > { %v1945_v61 = vpop.permute.xlu1 %581  ;;  %v1947_v62 = vpop.permute.xlu0 %576 }
  0xc2   : > { %v1951_v63 = vpop.permute.xlu0 %872 }
  0xc6   : > { %v1955_v1 = vpop.permute.xlu0 %1000 }
  0xca   : > { %v1959_v3 = vpop.permute.xlu0 %1150 }
  0xce   : > { %v1963_v6 = vpop.permute.xlu0 %586 }
  0xd2   : > { %v1967_v8 = vpop.permute.xlu0 %882 }
  0xd6   : > { %v1971_v10 = vpop.permute.xlu0 %1010 }
  0xda   : > { %v1975_v12 = vpop.permute.xlu0 %1160 }
 0x100   : > { %v491_v14 = vpop.f32.mrb[0].mxu0 }
 0x101   : > { %v492_v15 = vadd.f32 %v491_v14, %v413_v13  ;;  %v493_v16 = vpop.f32.mrb[1].mxu0  ;;  %v1979_v14 = vpop.permute.xlu0 %596 }
 0x102   : > { %v494_v18 = vadd.f32 %v493_v16, %v413_v13  ;;  %v495_v19 = vpop.f32.mrb[2].mxu0 }
 0x103   : > { %v496_v20 = vadd.f32 %v495_v19, %v418_v17  ;;  %v497_v21 = vpop.f32.mrb[3].mxu0  ;;  %v510_v24 = vmax.f32 %v492_v15, 0.0 }
 0x104   : > { %v498_v23 = vadd.f32 %v497_v21, %v418_v17  ;;  %v511_v26 = vmax.f32 %v494_v18, 0.0 }
 0x105   : > { %v512_v25 = vmax.f32 %v496_v20, 0.0  ;;  %v1983_v16 = vpop.permute.xlu0 %892 }
 0x106   : > { %v513_v27 = vmax.f32 %v498_v23, 0.0 }
 0x107   : > { %v534_v28 = vpack.c.bf16 %v512_v25, %v510_v24 }
 0x108   : > { %v501_v29 = vpop.f32.mrb[4].mxu0  ;;  %v535_v30 = vpack.c.bf16 %v513_v27, %v511_v26 }
 0x109   : > { %v502_v31 = vadd.f32 %v501_v29, %v423_v22  ;;  %v503_v32 = vpop.f32.mrb[5].mxu0  ;;  %v1987_v18 = vpop.permute.xlu0 %1020 }
 0x10a   : > { %v504_v34 = vadd.f32 %v503_v32, %v423_v22  ;;  %v505_v35 = vpop.f32.mrb[6].mxu0  ;;  %699 = vmatprep.subr.bf16.mxu1 %v535_v30 }
 0x10b   : > { %v506_v36 = vadd.f32 %v505_v35, %v428_v33  ;;  %v507_v37 = vpop.f32.mrb[7].mxu0  ;;  %700 = vmatpush1.bf16.msra.mxu1 %v534_v28  ;;  %v514_v39 = vmax.f32 %v502_v31, 0.0 }
 0x10c   : > { %v508_v38 = vadd.f32 %v507_v37, %v428_v33  ;;  %v515_v41 = vmax.f32 %v504_v34, 0.0 }
 0x10d   : > { %v516_v40 = vmax.f32 %v506_v36, 0.0  ;;  %v1991_v20 = vpop.permute.xlu0 %1170 }
 0x10e   : > { %v517_v42 = vmax.f32 %v508_v38, 0.0 }
 0x10f   : > { %v536_v43 = vpack.c.bf16 %v516_v40, %v514_v39 }
 0x110   : > { %v537_v44 = vpack.c.bf16 %v517_v42, %v515_v41 }
 0x111   : > { %v1995_v22 = vpop.permute.xlu0 %606 }
 0x112   : > { %701 = vmatprep.subr.bf16.mxu1 %v537_v44 }
 0x113   : > { %702 = vmatpush1.bf16.msra.mxu1 %v536_v43 }
 0x115   : > { %v1999_v24 = vpop.permute.xlu0 %902 }
 0x116   : > { %1432 = vmatmul.mubr.msk.bf16.vlgmr.msra.gmra.mrb[0].mxu1 %vm674_vm1, %v1494_v45 }
 0x117   : > { %741 = vmatprep.mubr.bf16.mxu1 %v1566_v4 }
 0x119   : > { %v2003_v26 = vpop.permute.xlu0 %1030 }
 0x11d   : > { %v2007_v28 = vpop.permute.xlu0 %1180 }
 0x11e   : > { %1433 = vmatmul.mubr.msk.bf16.gmra.mrb[4].mxu1 %vm674_vm1, %v1495_v46 }
 0x11f   : > { %751 = vmatprep.mubr.bf16.mxu1 %v1566_v4 }
 0x121   : > { %v2011_v30 = vpop.permute.xlu0 %616 }
 0x122   : > { %2211 = vst [vmem:[#allocation7_spill] sm:$0xff] %v2011_v30 }
 0x125   : > { %v2015_v40 = vpop.permute.xlu0 %912 }
 0x126   : > { %1434 = vmatmul.mubr.msk.bf16.gmra.mrb[8].mxu1 %vm674_vm1, %v1496_v47 }
 0x127   : > { %761 = vmatprep.mubr.bf16.mxu1 %v1566_v4 }
 0x12e   : > { %1435 = vmatmul.mubr.msk.bf16.gmra.mrb[12].mxu1 %vm674_vm1, %v1497_v48 }
 0x12f   : > { %771 = vmatprep.mubr.bf16.mxu1 %v1566_v4 }
 0x136   : > { %1436 = vmatmul.mubr.msk.bf16.gmra.mrb[16].mxu1 %vm674_vm1, %v1498_v49 }
 0x137   : > { %781 = vmatprep.mubr.bf16.mxu1 %v1566_v4 }
 0x13e   : > { %1437 = vmatmul.mubr.msk.bf16.gmra.mrb[20].mxu1 %vm674_vm1, %v1499_v50 }
 0x13f   : > { %791 = vmatprep.mubr.bf16.mxu1 %v1566_v4 }
 0x146   : > { %1438 = vmatmul.mubr.msk.bf16.gmra.mrb[24].mxu1 %vm674_vm1, %v1500_v51 }
 0x147   : > { %801 = vmatprep.mubr.bf16.mxu1 %v1566_v4  ;;  %v1949_v4 = vpop.permute.xlu1 %877 }
 0x14b   : > { %v1953_v0 = vpop.permute.xlu1 %1005 }
 0x14e   : > { %1439 = vmatmul.mubr.msk.bf16.gmra.mrb[28].mxu1 %vm674_vm1, %v1501_v52 }
 0x14f   : > { %v1957_v2 = vpop.permute.xlu1 %1155 }
 0x153   : > { %v1961_v5 = vpop.permute.xlu1 %591 }
 0x157   : > { %v1965_v7 = vpop.permute.xlu1 %887 }
 0x15b   : > { %v1969_v9 = vpop.permute.xlu1 %1015 }
 0x15f   : > { %v1973_v11 = vpop.permute.xlu1 %1165 }
 0x163   : > { %v1977_v13 = vpop.permute.xlu1 %601 }
 0x167   : > { %v1981_v15 = vpop.permute.xlu1 %897 }
 0x16b   : > { %v1985_v17 = vpop.permute.xlu1 %1025 }
 0x16f   : > { %v1989_v19 = vpop.permute.xlu1 %1175 }
 0x173   : > { %v1993_v21 = vpop.permute.xlu1 %611 }
 0x177   : > { %v1997_v23 = vpop.permute.xlu1 %907 }
 0x17b   : > { %v2001_v25 = vpop.permute.xlu1 %1035 }
 0x17f   : > { %v2005_v27 = vpop.permute.xlu1 %1185 }
 0x183   : > { %v2009_v29 = vpop.permute.xlu1 %621 }
 0x184   : > { %2210 = vst [vmem:[#allocation6_spill] sm:$0xff] %v2009_v29 }
 0x187   : > { %v2013_v36 = vpop.permute.xlu1 %917 }
 0x188   : > { %2212 = vst [vmem:[#allocation8_spill] sm:$0xff] %v2013_v36 }
 0x18b   : > { %v2017_v29 = vpop.permute.xlu1 %1045 }
 0x1e9   : > { %v733_v31 = vpop.f32.mrb[0].mxu1 }
 0x1ea   : > { %v734_v32 = vadd.f32 %v733_v31, %v557_v54  ;;  %v735_v33 = vpop.f32.mrb[1].mxu1 }
 0x1eb   : > { %v736_v34 = vadd.f32 %v735_v33, %v557_v54  ;;  %v737_v35 = vpop.f32.mrb[2].mxu1 }
 0x1ec   : > { %v812_v37 = vmax.f32 %v734_v32, 0.0  ;;  %v738_v38 = vadd.f32 %v737_v35, %v562_v53  ;;  %v739_v39 = vpop.f32.mrb[3].mxu1  ;;  %v1068_v44 = vmul.f32 %v991_v60, %v734_v32 }
 0x1ed   : > { %v813_v41 = vmax.f32 %v736_v34, 0.0  ;;  %v740_v42 = vadd.f32 %v739_v39, %v562_v53  ;;  %v1069_v47 = vmul.f32 %v991_v60, %v736_v34  ;;  %v2020_v53 = vpop.permute.xlu0 %1040 }
 0x1ee   : > { %v940_v43 = vmul.f32 %v863_v58, %v812_v37  ;;  %v814_v45 = vmax.f32 %v738_v38, 0.0  ;;  %v1070_v51 = vmul.f32 %v996_v59, %v738_v38 }
 0x1ef   : > { %v941_v46 = vmul.f32 %v863_v58, %v813_v41  ;;  %v815_v48 = vmax.f32 %v740_v42, 0.0  ;;  %v1071_v31 = vmul.f32 %v996_v59, %v740_v42 }
 0x1f0   : > { %v1100_v49 = vadd.f32 %v1068_v44, %v940_v43  ;;  %v942_v50 = vmul.f32 %v868_v57, %v814_v45 }
 0x1f1   : > { %v1101_v52 = vadd.f32 %v1069_v47, %v941_v46  ;;  %v943_v54 = vmul.f32 %v868_v57, %v815_v48  ;;  %v743_v33 = vpop.f32.mrb[4].mxu1 }
 0x1f2   : > { %v1102_v35 = vadd.f32 %v1070_v51, %v942_v50  ;;  %v744_v30 = vadd.f32 %v743_v33, %v1943_v56  ;;  %v745_v36 = vpop.f32.mrb[5].mxu1  ;;  %v1228_v34 = vadd.f32 %v1959_v3, %v1100_v49  ;;  %v2033_v50 = vpop.permute.xlu1 %1195 }
 0x1f3   : > { %v1103_v32 = vadd.f32 %v1071_v31, %v943_v54  ;;  %v746_v58 = vadd.f32 %v745_v36, %v1943_v56  ;;  %v747_v60 = vpop.f32.mrb[6].mxu1  ;;  %v1229_v42 = vadd.f32 %v1959_v3, %v1101_v52 }
 0x1f4   : > { %v1230_v37 = vadd.f32 %v1957_v2, %v1102_v35  ;;  %v816_v38 = vmax.f32 %v744_v30, 0.0  ;;  %v748_v57 = vadd.f32 %v747_v60, %v1941_v55  ;;  %v749_v59 = vpop.f32.mrb[7].mxu1  ;;  %v1072_v56 = vmul.f32 %v1955_v1, %v744_v30 }
 0x1f5   : > { %v817_v39 = vmax.f32 %v746_v58, 0.0  ;;  %v750_v41 = vadd.f32 %v749_v59, %v1941_v55  ;;  %v1231_v43 = vadd.f32 %v1957_v2, %v1103_v32  ;;  %v1073_v47 = vmul.f32 %v1955_v1, %v746_v58  ;;  %v2037_v2 = vpop.permute.xlu0 %1190 }
 0x1f6   : > { %v944_v44 = vmul.f32 %v1951_v63, %v816_v38  ;;  %v818_v36 = vmax.f32 %v748_v57, 0.0  ;;  %v1261_v45 = vpack.c.bf16 %v1230_v37, %v1228_v34  ;;  %v1074_v3 = vmul.f32 %v1953_v0, %v748_v57 }
 0x1f7   : > { %v945_v46 = vmul.f32 %v1951_v63, %v817_v39  ;;  %v819_v48 = vmax.f32 %v750_v41, 0.0  ;;  %v1262_v49 = vpack.c.bf16 %v1231_v43, %v1229_v42  ;;  %v1075_v54 = vmul.f32 %v1953_v0, %v750_v41  ;;  %v2049_v41 = vpop.permute.xlu1 %631 }
 0x1f8   : > { %v1104_v51 = vadd.f32 %v1072_v56, %v944_v44  ;;  %v946_v55 = vmul.f32 %v1949_v4, %v818_v36 }
 0x1f9   : > { %v1105_v52 = vadd.f32 %v1073_v47, %v945_v46  ;;  %v947_v30 = vmul.f32 %v1949_v4, %v819_v48  ;;  %v753_v31 = vpop.f32.mrb[8].mxu1  ;;  %1283 = vmatprep.subr.bf16.mxu0 %v1262_v49  ;;  %v2053_v56 = vpop.permute.xlu0 %626 }
 0x1fa   : > { %v1106_v63 = vadd.f32 %v1074_v3, %v946_v55  ;;  %v754_v1 = vadd.f32 %v753_v31, %v1947_v62  ;;  %v755_v33 = vpop.f32.mrb[9].mxu1  ;;  %1284 = vmatpush1.bf16.msra.mxu0 %v1261_v45  ;;  %v1232_v60 = vadd.f32 %v1975_v12, %v1104_v51 }
 0x1fb   : > { %v1107_v35 = vadd.f32 %v1075_v54, %v947_v30  ;;  %v756_v32 = vadd.f32 %v755_v33, %v1947_v62  ;;  %v757_v58 = vpop.f32.mrb[10].mxu1  ;;  %v1233_v59 = vadd.f32 %v1975_v12, %v1105_v52  ;;  %v2063_v31 = vpop.permute.xlu1 %927 }
 0x1fc   : > { %v1234_v34 = vadd.f32 %v1973_v11, %v1106_v63  ;;  %v820_v37 = vmax.f32 %v754_v1, 0.0  ;;  %v758_v4 = vadd.f32 %v757_v58, %v1945_v61  ;;  %v759_v38 = vpop.f32.mrb[11].mxu1  ;;  %v1076_v42 = vmul.f32 %v1971_v10, %v754_v1 }
 0x1fd   : > { %v821_v0 = vmax.f32 %v756_v32, 0.0  ;;  %v760_v57 = vadd.f32 %v759_v38, %v1945_v61  ;;  %v1235_v39 = vadd.f32 %v1973_v11, %v1107_v35  ;;  %v1077_v45 = vmul.f32 %v1971_v10, %v756_v32  ;;  %v2068_v35 = vpop.permute.xlu0 %922 }
 0x1fe   : > { %v948_v62 = vmul.f32 %v1967_v8, %v820_v37  ;;  %v822_v43 = vmax.f32 %v758_v4, 0.0  ;;  %v1263_v44 = vpack.c.bf16 %v1234_v34, %v1232_v60  ;;  %v1078_v11 = vmul.f32 %v1969_v9, %v758_v4 }
 0x1ff   : > { %v949_v36 = vmul.f32 %v1967_v8, %v821_v0  ;;  %v823_v46 = vmax.f32 %v760_v57, 0.0  ;;  %v1264_v61 = vpack.c.bf16 %v1235_v39, %v1233_v59  ;;  %v1079_v51 = vmul.f32 %v1969_v9, %v760_v57 }
 0x200   : > { %v1108_v47 = vadd.f32 %v1076_v42, %v948_v62  ;;  %v950_v12 = vmul.f32 %v1965_v7, %v822_v43 }
 0x201   : > { %v1109_v48 = vadd.f32 %v1077_v45, %v949_v36  ;;  %v951_v49 = vmul.f32 %v1965_v7, %v823_v46  ;;  %v763_v55 = vpop.f32.mrb[12].mxu1  ;;  %1285 = vmatprep.subr.bf16.mxu0 %v1264_v61  ;;  %v2081_v36 = vpop.permute.xlu1 %1055 }
 0x202   : > { %v1110_v3 = vadd.f32 %v1078_v11, %v950_v12  ;;  %v764_v52 = vadd.f32 %v763_v55, %v1963_v6  ;;  %v765_v8 = vpop.f32.mrb[13].mxu1  ;;  %1286 = vmatpush1.bf16.msra.mxu0 %v1263_v44  ;;  %v1236_v63 = vadd.f32 %v1991_v20, %v1108_v47  ;;  %v2084_v46 = vpop.permute.xlu0 %1050 }
 0x203   : > { %v1111_v10 = vadd.f32 %v1079_v51, %v951_v49  ;;  %v766_v30 = vadd.f32 %v765_v8, %v1963_v6  ;;  %v767_v54 = vpop.f32.mrb[14].mxu1  ;;  %v1237_v60 = vadd.f32 %v1991_v20, %v1109_v48 }
 0x204   : > { %v1238_v1 = vadd.f32 %v1989_v19, %v1110_v3  ;;  %v824_v7 = vmax.f32 %v764_v52, 0.0  ;;  %v768_v9 = vadd.f32 %v767_v54, %v1961_v5  ;;  %v769_v33 = vpop.f32.mrb[15].mxu1  ;;  %v1080_v37 = vmul.f32 %v1987_v18, %v764_v52 }
 0x205   : > { %v825_v32 = vmax.f32 %v766_v30, 0.0  ;;  %v770_v58 = vadd.f32 %v769_v33, %v1961_v5  ;;  %v1239_v6 = vadd.f32 %v1989_v19, %v1111_v10  ;;  %v1081_v57 = vmul.f32 %v1987_v18, %v766_v30 }
 0x206   : > { %v952_v34 = vmul.f32 %v1983_v16, %v824_v7  ;;  %v826_v4 = vmax.f32 %v768_v9, 0.0  ;;  %v1265_v38 = vpack.c.bf16 %v1238_v1, %v1236_v63  ;;  %v1082_v5 = vmul.f32 %v1985_v17, %v768_v9  ;;  %v1206_v9 = vpop.permute.xlu1 %1205 }
 0x207   : > { %v953_v0 = vmul.f32 %v1983_v16, %v825_v32  ;;  %v827_v59 = vmax.f32 %v770_v58, 0.0  ;;  %v1266_v39 = vpack.c.bf16 %v1239_v6, %v1237_v60  ;;  %v1083_v43 = vmul.f32 %v1985_v17, %v770_v58  ;;  %v1201_v32 = vpop.permute.xlu0 %1200 }
 0x208   : > { %v1112_v62 = vadd.f32 %v1080_v37, %v952_v34  ;;  %v954_v42 = vmul.f32 %v1981_v15, %v826_v4 }
 0x209   : > { %v1113_v20 = vadd.f32 %v1081_v57, %v953_v0  ;;  %v955_v19 = vmul.f32 %v1981_v15, %v827_v59  ;;  %v773_v44 = vpop.f32.mrb[16].mxu1  ;;  %1287 = vmatprep.subr.bf16.mxu0 %v1266_v39 }
 0x20a   : > { %v1114_v45 = vadd.f32 %v1082_v5, %v954_v42  ;;  %v774_v16 = vadd.f32 %v773_v44, %v1979_v14  ;;  %v775_v18 = vpop.f32.mrb[17].mxu1  ;;  %1288 = vmatpush1.bf16.msra.mxu0 %v1265_v38  ;;  %v1240_v11 = vadd.f32 %v2007_v28, %v1112_v62 }
 0x20b   : > { %v1115_v61 = vadd.f32 %v1083_v43, %v955_v19  ;;  %v776_v47 = vadd.f32 %v775_v18, %v1979_v14  ;;  %v777_v12 = vpop.f32.mrb[18].mxu1  ;;  %v1241_v3 = vadd.f32 %v2007_v28, %v1113_v20  ;;  %v2109_v20 = vpop.permute.xlu1 %937 }
 0x20c   : > { %v1242_v15 = vadd.f32 %v2005_v27, %v1114_v45  ;;  %v828_v17 = vmax.f32 %v774_v16, 0.0  ;;  %v778_v48 = vadd.f32 %v777_v12, %v1977_v13  ;;  %v779_v49 = vpop.f32.mrb[19].mxu1  ;;  %v1084_v14 = vmul.f32 %v2003_v26, %v774_v16  ;;  %v2113_v45 = vpop.permute.xlu0 %932 }
 0x20d   : > { %v829_v51 = vmax.f32 %v776_v47, 0.0  ;;  %v780_v55 = vadd.f32 %v779_v49, %v1977_v13  ;;  %v1243_v52 = vadd.f32 %v2005_v27, %v1115_v61  ;;  %v1085_v63 = vmul.f32 %v2003_v26, %v776_v47 }
 0x20e   : > { %v956_v8 = vmul.f32 %v1999_v24, %v828_v17  ;;  %v830_v10 = vmax.f32 %v778_v48, 0.0  ;;  %v1267_v30 = vpack.c.bf16 %v1242_v15, %v1240_v11  ;;  %v1086_v28 = vmul.f32 %v2001_v25, %v778_v48 }
 0x20f   : > { %v957_v54 = vmul.f32 %v1999_v24, %v829_v51  ;;  %v831_v1 = vmax.f32 %v780_v55, 0.0  ;;  %v1268_v7 = vpack.c.bf16 %v1243_v52, %v1241_v3  ;;  %v1087_v60 = vmul.f32 %v2001_v25, %v780_v55  ;;  %v2214_v51 = vld [vmem:[#allocation7_spill] sm:$0xff] }
 0x210   : > { %v1116_v33 = vadd.f32 %v1084_v14, %v956_v8  ;;  %v958_v13 = vmul.f32 %v1997_v23, %v830_v10  ;;  %v1066_v8 = vpop.permute.xlu1 %1065 }
 0x211   : > { %v1117_v27 = vadd.f32 %v1085_v63, %v957_v54  ;;  %v959_v58 = vmul.f32 %v1997_v23, %v831_v1  ;;  %v783_v6 = vpop.f32.mrb[20].mxu1  ;;  %1289 = vmatprep.subr.bf16.mxu0 %v1268_v7  ;;  %v2215_v54 = vld [vmem:[#allocation6_spill] sm:$0xff]  ;;  %v1061_v7 = vpop.permute.xlu0 %1060 }
 0x212   : > { %v1118_v34 = vadd.f32 %v1086_v28, %v958_v13  ;;  %v784_v24 = vadd.f32 %v783_v6, %v1995_v22  ;;  %v785_v26 = vpop.f32.mrb[21].mxu1  ;;  %1290 = vmatpush1.bf16.msra.mxu0 %v1267_v30  ;;  %v1244_v0 = vadd.f32 %v2037_v2, %v1116_v33 }
 0x213   : > { %v1119_v37 = vadd.f32 %v1087_v60, %v959_v58  ;;  %v786_v4 = vadd.f32 %v785_v26, %v1995_v22  ;;  %v787_v38 = vpop.f32.mrb[22].mxu1  ;;  %v1245_v42 = vadd.f32 %v2037_v2, %v1117_v27  ;;  %v2213_v2 = vld [vmem:[#allocation8_spill] sm:$0xff] }
 0x214   : > { %v1246_v57 = vadd.f32 %v2033_v50, %v1118_v34  ;;  %v832_v59 = vmax.f32 %v784_v24, 0.0  ;;  %v788_v23 = vadd.f32 %v787_v38, %v1993_v21  ;;  %v789_v39 = vpop.f32.mrb[23].mxu1  ;;  %v1088_v19 = vmul.f32 %v2020_v53, %v784_v24 }
 0x215   : > { %v833_v25 = vmax.f32 %v786_v4, 0.0  ;;  %v790_v62 = vadd.f32 %v789_v39, %v1993_v21  ;;  %v1247_v5 = vadd.f32 %v2033_v50, %v1119_v37  ;;  %v1089_v18 = vmul.f32 %v2020_v53, %v786_v4 }
 0x216   : > { %v960_v22 = vmul.f32 %v2015_v40, %v832_v59  ;;  %v834_v43 = vmax.f32 %v788_v23, 0.0  ;;  %v1269_v44 = vpack.c.bf16 %v1246_v57, %v1244_v0  ;;  %v1090_v50 = vmul.f32 %v2017_v29, %v788_v23  ;;  %v1216_v23 = vpop.permute.xlu1 %1215 }
 0x217   : > { %v961_v16 = vmul.f32 %v2015_v40, %v833_v25  ;;  %v835_v61 = vmax.f32 %v790_v62, 0.0  ;;  %v1270_v21 = vpack.c.bf16 %v1247_v5, %v1245_v42  ;;  %v1091_v17 = vmul.f32 %v2017_v29, %v790_v62 }
 0x218   : > { %v1120_v47 = vadd.f32 %v1088_v19, %v960_v22  ;;  %v962_v12 = vmul.f32 %v2213_v2, %v834_v43 }
 0x219   : > { %v1121_v11 = vadd.f32 %v1089_v18, %v961_v16  ;;  %v963_v15 = vmul.f32 %v2213_v2, %v835_v61  ;;  %v793_v48 = vpop.f32.mrb[24].mxu1  ;;  %1291 = vmatprep.subr.bf16.mxu0 %v1270_v21 }
 0x21a   : > { %v1122_v49 = vadd.f32 %v1090_v50, %v962_v12  ;;  %v794_v55 = vadd.f32 %v793_v48, %v2214_v51  ;;  %v795_v40 = vpop.f32.mrb[25].mxu1  ;;  %1292 = vmatpush1.bf16.msra.mxu0 %v1269_v44  ;;  %v1248_v14 = vadd.f32 %v1201_v32, %v1120_v47 }
 0x21b   : > { %v1123_v53 = vadd.f32 %v1091_v17, %v963_v15  ;;  %v796_v3 = vadd.f32 %v795_v40, %v2214_v51  ;;  %v797_v52 = vpop.f32.mrb[26].mxu1  ;;  %v1249_v13 = vadd.f32 %v1201_v32, %v1121_v11 }
 0x21c   : > { %v1250_v10 = vadd.f32 %v1206_v9, %v1122_v49  ;;  %v836_v30 = vmax.f32 %v794_v55, 0.0  ;;  %v798_v63 = vadd.f32 %v797_v52, %v2215_v54  ;;  %v799_v1 = vpop.f32.mrb[27].mxu1  ;;  %v1092_v58 = vmul.f32 %v2084_v46, %v794_v55 }
 0x21d   : > { %v837_v29 = vmax.f32 %v796_v3, 0.0  ;;  %v800_v33 = vadd.f32 %v799_v1, %v2215_v54  ;;  %v1251_v28 = vadd.f32 %v1206_v9, %v1123_v53  ;;  %v1093_v24 = vmul.f32 %v2084_v46, %v796_v3  ;;  %v1211_v46 = vpop.permute.xlu0 %1210  ;;  %v1226_v53 = vpop.permute.xlu1 %1225 }
 0x21e   : > { %v964_v27 = vmul.f32 %v2068_v35, %v836_v30  ;;  %v838_v60 = vmax.f32 %v798_v63, 0.0  ;;  %v1271_v6 = vpack.c.bf16 %v1250_v10, %v1248_v14  ;;  %v1094_v0 = vmul.f32 %v2081_v36, %v798_v63 }
 0x21f   : > { %v965_v34 = vmul.f32 %v2068_v35, %v837_v29  ;;  %v839_v26 = vmax.f32 %v800_v33, 0.0  ;;  %v1272_v37 = vpack.c.bf16 %v1251_v28, %v1249_v13  ;;  %v1095_v32 = vmul.f32 %v2081_v36, %v800_v33 }
 0x220   : > { %v1124_v4 = vadd.f32 %v1092_v58, %v964_v27  ;;  %v966_v38 = vmul.f32 %v2063_v31, %v838_v60 }
 0x221   : > { %v1125_v57 = vadd.f32 %v1093_v24, %v965_v34  ;;  %v967_v9 = vmul.f32 %v2063_v31, %v839_v26  ;;  %v803_v59 = vpop.f32.mrb[28].mxu1  ;;  %1293 = vmatprep.subr.bf16.mxu0 %v1272_v37  ;;  %v1221_v3 = vpop.permute.xlu0 %1220 }
 0x222   : > { %v1126_v39 = vadd.f32 %v1094_v0, %v966_v38  ;;  %v804_v35 = vadd.f32 %v803_v59, %v2053_v56  ;;  %v805_v25 = vpop.f32.mrb[29].mxu1  ;;  %1294 = vmatpush1.bf16.msra.mxu0 %v1271_v6  ;;  %v1252_v22 = vadd.f32 %v1211_v46, %v1124_v4 }
 0x223   : > { %v1127_v62 = vadd.f32 %v1095_v32, %v967_v9  ;;  %v806_v42 = vadd.f32 %v805_v25, %v2053_v56  ;;  %v807_v5 = vpop.f32.mrb[30].mxu1  ;;  %v1253_v18 = vadd.f32 %v1211_v46, %v1125_v57 }
 0x224   : > { %v1254_v19 = vadd.f32 %v1216_v23, %v1126_v39  ;;  %v840_v43 = vmax.f32 %v804_v35, 0.0  ;;  %v808_v31 = vadd.f32 %v807_v5, %v2049_v41  ;;  %v809_v44 = vpop.f32.mrb[31].mxu1  ;;  %v1096_v47 = vmul.f32 %v1061_v7, %v804_v35 }
 0x225   : > { %v841_v36 = vmax.f32 %v806_v42, 0.0  ;;  %v810_v16 = vadd.f32 %v809_v44, %v2049_v41  ;;  %v1255_v61 = vadd.f32 %v1216_v23, %v1127_v62  ;;  %v1097_v56 = vmul.f32 %v1061_v7, %v806_v42 }
 0x226   : > { %v968_v21 = vmul.f32 %v2113_v45, %v840_v43  ;;  %v842_v2 = vmax.f32 %v808_v31, 0.0  ;;  %v1273_v12 = vpack.c.bf16 %v1254_v19, %v1252_v22  ;;  %v1098_v49 = vmul.f32 %v1066_v8, %v808_v31 }
 0x227   : > { %v969_v50 = vmul.f32 %v2113_v45, %v841_v36  ;;  %v843_v11 = vmax.f32 %v810_v16, 0.0  ;;  %v1274_v15 = vpack.c.bf16 %v1255_v61, %v1253_v18  ;;  %v1099_v41 = vmul.f32 %v1066_v8, %v810_v16  ;;  %v1281_v8 = vpop.permute.xlu0 %1280 }
 0x228   : > { %v1128_v17 = vadd.f32 %v1096_v47, %v968_v21  ;;  %v970_v48 = vmul.f32 %v2109_v20, %v842_v2 }
 0x229   : > { %v1129_v51 = vadd.f32 %v1097_v56, %v969_v50  ;;  %v971_v55 = vmul.f32 %v2109_v20, %v843_v11  ;;  %1295 = vmatprep.subr.bf16.mxu0 %v1274_v15  ;;  %v1260_v20 = vld [vmem:[%s2202_s8] sm:$0x3] }
 0x22a   : > { %v1130_v40 = vadd.f32 %v1098_v49, %v970_v48  ;;  %1296 = vmatpush1.bf16.msra.mxu0 %v1273_v12  ;;  %v1256_v45 = vadd.f32 %v1221_v3, %v1128_v17 }
 0x22b   : > { %v1131_v52 = vadd.f32 %v1099_v41, %v971_v55  ;;  %v1257_v10 = vadd.f32 %v1221_v3, %v1129_v51 }
 0x22c   : > { %v1258_v14 = vadd.f32 %v1226_v53, %v1130_v40 }
 0x22d   : > { %v1259_v30 = vadd.f32 %v1226_v53, %v1131_v52 }
 0x22e   : > { %v1275_v54 = vpack.c.bf16 %v1258_v14, %v1256_v45 }
 0x22f   : > { %v1276_v63 = vpack.c.bf16 %v1259_v30, %v1257_v10 }
 0x231   : > { %1297 = vmatprep.subr.bf16.mxu0 %v1276_v63 }
 0x232   : > { %1298 = vmatpush1.bf16.msra.mxu0 %v1275_v54 }
 0x235   : > { %1316 = vmatmul.mubr.bf16.vlgmr.msra.gmra.mrb[8].mxu0 %v1260_v20 }
 0x308   : > { %v1317_v1 = vpop.f32.mrb[8].mxu0 }
 0x309   : > { %v1318_v7 = vadd.f32 %v1317_v1, %v1281_v8  ;;  %v1319_v29 = vpop.f32.mrb[9].mxu0 }
 0x30a   : > { %v1320_v33 = vadd.f32 %v1319_v29, %v1281_v8  ;;  %v1321_v13 = vpop.f32.mrb[10].mxu0 }
 0x30b   : > { %v1322_v28 = vpop.f32.mrb[11].mxu0 }
 0x30c   : > { %v1326_v27 = vcombine.low %v1318_v7, %v1320_v33 }
 0x30e   : > { %1328 = vst [vmem:[%s396_s26] sm:$0xff] %v1326_v27 }
 0x30f   : > { %1515 = shalt.err (!%p1512_p5)
}
 0x310   : > { %s1516_s25 = scalar_lea.hbm %s2150_s30, 128  ;;  %s1520_s28 = scalar_lea.hbm %s2204_s10, 256 }
 0x311   : > { %p1517_p7 = scmp.ne.s32.totalorder %s2150_s30, %s1516_s25  ;;  %p1521_p12 = scmp.lt.u32.totalorder %s2150_s30, %s2204_s10 }
 0x312   : > { %p1522_p13 = scmp.lt.u32.totalorder %s1520_s28, %s1516_s25  ;;  %p1524_p1 = scmp.lt.u32.totalorder %s1516_s25, %s2150_s30 }
 0x313   : > { %p1518_p10 = pnand %p1517_p7, %p1661_p6 }
 0x314   : > { %p1523_p0 = por %p1522_p13, %p1521_p12 }
 0x315   : > { %p1519_p11 = pneg %p1518_p10 }
 0x316   : > { %p1525_p2 = por %p1524_p1, %p1523_p0 }
 0x318   : > { %p1526_p3 = pnand %p1525_p2, %p1519_p11 }
 0x31a   : > { %1529 = shalt.err (!%p1526_p3)
}
 0x31b   : > { %1447 = dma.vmem_to_hbm [thread:$0]  (%p1661_p6), %s2152_s27, 128, %s2150_s30, %s1330_s11  }
 0x31c PF: > { %s1356_s12 = sand.u32 1, %s1552_s13   ;;  %p1450_p4 = pnand %p1411_p9, %p1665_p8 }
 0x31d   : > { %s1357_s18 = scalar_lea.sflag [#allocation4], %s1356_s12 }
 0x31e   : > { %1547 = dma.done.wait (!%p1450_p4), %s1357_s18, 128  }
 0x31f   : > { %1549 = vsyncadd (!%p1450_p4), %s1357_s18, 4294967168  ;;  %p20_p5 = scmp.ge.s32.totalorder %s1646_s19, 4   ;;  %s2216_s13 = smov %s1556_s14 }
 0x320   : > { %s2217_s14 = smov %s1560_s15  ;;  %s2218_s15 = smov %s1659_s22 }
 0x321   : > { %s2219_s16 = smov %s1646_s19  ;;  %22 = sbr.rel (!%p20_p5) target bundleno = 3 (0x3), region = 138 }
 0x328   :  { %1362 = vsyncpa [#allocation4], 1 }
 0x329   :  { %1364 = vsyncpa [#allocation4 + $0x1], 1 }

</bundles_post_ra>
